<compile_context>
chip_gen: v7x
topology: tpu7x:2x2x1
jax: 0.10.0
libtpu: 0.0.40
codegen_flags: <defaults>
</compile_context>

<pallas_src>
import math

import jax
import jax.numpy as jnp
from jax.experimental import pallas as pl
from jax.experimental.pallas import tpu as pltpu


_SQRT_2_OVER_PI = math.sqrt(2.0 / math.pi)


def _gelu_tanh(x):
    # GELU(approximate='tanh'), matching torch.nn.GELU(approximate='tanh').
    # tanh goes to the EUP, the polynomial to the VPU -> effectively free in an
    # MXU/DMA-bound kernel; computed on the f32 accumulator.
    return 0.5 * x * (1.0 + jnp.tanh(_SQRT_2_OVER_PI * (x + 0.044715 * x * x * x)))


def _mlp_kernel(x_ref, w1t_ref, w2t_ref, o_ref):
    # x_ref:   (TM, C) f32 tile of flattened tokens (cast to bf16 in VMEM)
    # w1t_ref: (C,  H) bf16 fc1.weight^T   (constant index_map -> resident)
    # w2t_ref: (H,  H) bf16 fc2.weight^T   (constant index_map -> resident)
    # o_ref:   (TM, H) out_dtype
    x_bf = x_ref[...].astype(jnp.bfloat16)          # VPU cast, free under MXU/DMA slots
    h = jnp.dot(x_bf, w1t_ref[...], preferred_element_type=jnp.float32)
    h = _gelu_tanh(h)
    out = jnp.dot(h.astype(w2t_ref.dtype), w2t_ref[...],
                  preferred_element_type=jnp.float32)
    o_ref[...] = out.astype(o_ref.dtype)


def _round_up(x, m):
    return ((x + m - 1) // m) * m


def _num_tensorcores():
    # v7x has 2 TensorCores per chip; v5e/v6e have 1.  Best-effort detection.
    try:
        kind = (getattr(jax.devices()[0], "device_kind", "") or "").lower()
        if "v7" in kind:
            return 2
    except Exception:
        pass
    return 1


def _vmem_capacity_bytes():
    try:
        return int(pltpu.get_tpu_info().vmem_capacity_bytes)
    except Exception:
        return 128 << 20   # v5e/v6e physical VMEM; conservative default


def avclip_projection(x_flat, w1t, w2t, *, tile_m=512, out_dtype=jnp.bfloat16):
    """x_flat: (M, C) f32; w1t: (C, H) bf16; w2t: (H, H) bf16 -> (M, H) out_dtype.

    Matmuls run with bf16 operands / f32 accumulation on the MXU.
    """
    m, c = x_flat.shape
    h = w1t.shape[1]

    # Effective M tile: as large as useful, multiple of 8 sublanes, no padding.
    tile = max(8, min(_round_up(m, 8), (max(tile_m, 8) // 8) * 8))
    # v7x: keep >= 2 parallel grid steps so both TensorCores get work.
    if _num_tensorcores() >= 2 and m > 8:
        tile = min(tile, max(8, _round_up(pl.cdiv(m, 2), 8)))
    grid = (pl.cdiv(m, tile),)   # ragged last block: OOB reads masked rows, OOB writes dropped

    in_specs = [
        pl.BlockSpec((tile, c), lambda i: (i, 0)),
        # Constant index_map -> Pallas does not re-DMA the weights each step.
        pl.BlockSpec((c, h), lambda i: (0, 0)),
        pl.BlockSpec((h, h), lambda i: (0, 0)),
    ]
    # H kept lane-dense (multiple of 128 in the model config) for unmasked vst.
    out_specs = pl.BlockSpec((tile, h), lambda i: (i, 0))

    out_itemsize = jnp.dtype(out_dtype).itemsize
    # VMEM budget: double-buffered x/out tiles + double-buffered weight residency.
    need = (2 * (tile * c * 4 + tile * h * out_itemsize)
            + 2 * (c * h + h * h) * 2
            + (4 << 20))
    cap = (6 * _vmem_capacity_bytes()) // 10          # ~60% of physical VMEM
    vmem_limit = int(min(max(need, 16 << 20), cap))
    # TODO(synk): for much larger C/H, tile W2t along an extra H (N-dim) grid
    # axis instead of relying on full weight residency.

    cost = pl.CostEstimate(
        flops=2 * m * (c * h + h * h),
        transcendentals=m * h,
        bytes_accessed=m * c * 4 + (c * h + h * h) * 2 + m * h * out_itemsize,
    )

    return pl.pallas_call(
        _mlp_kernel,
        out_shape=jax.ShapeDtypeStruct((m, h), out_dtype),
        grid_spec=pltpu.PrefetchScalarGridSpec(
            num_scalar_prefetch=0,
            grid=grid,
            in_specs=in_specs,
            out_specs=out_specs,
        ),
        compiler_params=pltpu.CompilerParams(
            dimension_semantics=("parallel",),
            vmem_limit_bytes=vmem_limit,
        ),
        cost_estimate=cost,
    )(x_flat, w1t, w2t)


class AVCLIPEmbedderJAX:
    """JAX/Pallas port of AVCLIPEmbedder (projection MLP + CFG token drop)."""

    def __init__(self, in_channels, hidden_size, dropout_p, token_num=32,
                 key=None, out_dtype=jnp.bfloat16):
        self.in_channels = in_channels
        self.hidden_size = hidden_size
        self.dropout_p = dropout_p
        self.token_num = token_num
        self.out_dtype = out_dtype
        if key is None:
            key = jax.random.PRNGKey(0)
        k1, k2, k3 = jax.random.split(key, 3)
        # nn.Linear(in, hid, bias=False).weight has shape (hid, in); store the
        # transposed version used directly in the kernel matmul, cast to bf16
        # ONCE here (no per-call cast pass over HBM).
        lim1 = 1.0 / math.sqrt(in_channels)
        lim2 = 1.0 / math.sqrt(hidden_size)
        self.w1t = jax.random.uniform(
            k1, (in_channels, hidden_size), jnp.float32, -lim1, lim1
        ).astype(jnp.bfloat16)
        self.w2t = jax.random.uniform(
            k2, (hidden_size, hidden_size), jnp.float32, -lim2, lim2
        ).astype(jnp.bfloat16)
        self.uncond_embedding = (
            jax.random.normal(k3, (token_num, in_channels), jnp.float32)
            / math.sqrt(in_channels)
        )

    def token_drop(self, feats, drop_key=None, force_drop_ids=None):
        # Classifier-free-guidance token dropping (train-only glue, plain JAX).
        if force_drop_ids is None:
            drop_ids = jax.random.uniform(drop_key, (feats.shape[0],)) < self.dropout_p
        else:
            drop_ids = force_drop_ids == 1
        return jnp.where(drop_ids[:, None, None], self.uncond_embedding, feats)

    def __call__(self, x, train=False, drop_key=None, force_drop_ids=None, tile_m=512):
        # x: (B, T, C)
        use_dropout = self.dropout_p > 0.0
        if train and use_dropout:
            x = self.token_drop(x, drop_key=drop_key, force_drop_ids=force_drop_ids)
        b, t, c = x.shape
        x_flat = x.reshape(b * t, c).astype(jnp.float32)
        out = avclip_projection(x_flat, self.w1t, self.w2t,
                                tile_m=tile_m, out_dtype=self.out_dtype)
        return out.reshape(b, t, self.hidden_size)


def _reference_bf16(x_flat, w1t_bf, w2t_bf, out_dtype):
    # Same precision recipe as the kernel (bf16 operands, f32 accumulation).
    xb = x_flat.astype(jnp.bfloat16)
    h = jnp.dot(xb, w1t_bf, preferred_element_type=jnp.float32)
    h = _gelu_tanh(h).astype(jnp.bfloat16)
    out = jnp.dot(h, w2t_bf, preferred_element_type=jnp.float32)
    return out.astype(out_dtype)


if __name__ == "__main__":
    key = jax.random.PRNGKey(0)
    k_param, k_x, k_x2 = jax.random.split(key, 3)

    in_channels = 128        # lane-aligned (multiple of 128)
    hidden_size = 256        # lane-dense output, MXU-aligned
    token_num = 32           # module default

    module = AVCLIPEmbedderJAX(
        in_channels=in_channels,
        hidden_size=hidden_size,
        dropout_p=0.1,
        token_num=token_num,
        key=k_param,
    )

    # Case 1: M = 4*32 = 128 rows (aligned, multi-step only on 2-TC chips).
    x = jax.random.normal(k_x, (4, token_num, in_channels), jnp.float32)
    out = jax.block_until_ready(module(x, train=False))   # default forward path
    assert out.shape == (4, token_num, hidden_size)

    ref = _reference_bf16(x.reshape(-1, in_channels), module.w1t, module.w2t,
                          module.out_dtype).reshape(4, token_num, hidden_size)
    err = jnp.max(jnp.abs(out.astype(jnp.float32) - ref.astype(jnp.float32)))
    assert float(err) < 2e-2, float(err)

    # Loose check against full-f32 math (bf16 is a documented precision choice).
    f32_ref = (_gelu_tanh(x.reshape(-1, in_channels) @ module.w1t.astype(jnp.float32))
               @ module.w2t.astype(jnp.float32)).reshape(4, token_num, hidden_size)
    assert jnp.allclose(out.astype(jnp.float32), f32_ref, atol=7e-2, rtol=7e-2)

    # Case 2: ragged M = 3*10 = 30 (not a multiple of 8 or of the tile)
    # -> exercises the masked last block (no pad / slice passes).
    x2 = jax.random.normal(k_x2, (3, 10, in_channels), jnp.float32)
    out2 = jax.block_until_ready(module(x2, train=False, tile_m=64))
    assert out2.shape == (3, 10, hidden_size)
    ref2 = _reference_bf16(x2.reshape(-1, in_channels), module.w1t, module.w2t,
                           module.out_dtype).reshape(3, 10, hidden_size)
    err2 = jnp.max(jnp.abs(out2.astype(jnp.float32) - ref2.astype(jnp.float32)))
    assert float(err2) < 2e-2, float(err2)

    print("KERNEL_OK")
</pallas_src>

<mosaic_0001>
module attributes {stable_mosaic.version = 11 : i64} {
  func.func @_mlp_kernel(%arg0: i32, %arg1: memref<128x128xf32, #tpu.memory_space<vmem>>, %arg2: memref<128x256xbf16, #tpu.memory_space<vmem>>, %arg3: memref<256x256xbf16, #tpu.memory_space<vmem>>, %arg4: memref<128x256xbf16, #tpu.memory_space<vmem>>) attributes {dimension_semantics = [#tpu.dimension_semantics<parallel>], iteration_bounds = array<i64: 1>, scalar_prefetch = 0 : i64, scratch_operands = 0 : i64, tpu.core_type = #tpu.core_type<tc>, window_params = [{transform_indices = @transform_0, window_bounds = array<i64: 128, 128>}, {pipeline_mode = #tpu.pipeline_mode<synchronous>, transform_indices = @transform_1, window_bounds = array<i64: 128, 256>}, {pipeline_mode = #tpu.pipeline_mode<synchronous>, transform_indices = @transform_2, window_bounds = array<i64: 256, 256>}, {transform_indices = @transform_3, window_bounds = array<i64: 128, 256>}]} {
    %c0 = arith.constant 0 : index
    %c0_0 = arith.constant 0 : index
    %0 = vector.load %arg1[%c0, %c0_0] : memref<128x128xf32, #tpu.memory_space<vmem>>, vector<128x128xf32>
    %1 = arith.truncf %0 : vector<128x128xf32> to vector<128x128xbf16>
    %c0_1 = arith.constant 0 : index
    %c0_2 = arith.constant 0 : index
    %2 = vector.load %arg2[%c0_1, %c0_2] : memref<128x256xbf16, #tpu.memory_space<vmem>>, vector<128x256xbf16>
    %cst = arith.constant dense<0.000000e+00> : vector<128x256xf32>
    %3 = tpu.matmul %1, %2, %cst {dimension_numbers = #tpu.dot_dimension_numbers<[1], [0], [0], [1], [0, 0, 1, 1], [], []>} : vector<128x128xbf16>, vector<128x256xbf16>, vector<128x256xf32> -> vector<128x256xf32>
    %cst_3 = arith.constant 5.000000e-01 : f32
    %4 = vector.broadcast %cst_3 : f32 to vector<128x256xf32>
    %5 = arith.mulf %4, %3 : vector<128x256xf32>
    %cst_4 = arith.constant 4.471500e-02 : f32
    %6 = vector.broadcast %cst_4 : f32 to vector<128x256xf32>
    %7 = arith.mulf %6, %3 : vector<128x256xf32>
    %8 = arith.mulf %7, %3 : vector<128x256xf32>
    %9 = arith.mulf %8, %3 : vector<128x256xf32>
    %10 = arith.addf %3, %9 : vector<128x256xf32>
    %cst_5 = arith.constant 0.797884583 : f32
    %11 = vector.broadcast %cst_5 : f32 to vector<128x256xf32>
    %12 = arith.mulf %11, %10 : vector<128x256xf32>
    %13 = math.tanh %12 : vector<128x256xf32>
    %cst_6 = arith.constant 1.000000e+00 : f32
    %14 = vector.broadcast %cst_6 : f32 to vector<128x256xf32>
    %15 = arith.addf %14, %13 : vector<128x256xf32>
    %16 = arith.mulf %5, %15 : vector<128x256xf32>
    %17 = arith.truncf %16 : vector<128x256xf32> to vector<128x256xbf16>
    %c0_7 = arith.constant 0 : index
    %c0_8 = arith.constant 0 : index
    %18 = vector.load %arg3[%c0_7, %c0_8] : memref<256x256xbf16, #tpu.memory_space<vmem>>, vector<256x256xbf16>
    %cst_9 = arith.constant dense<0.000000e+00> : vector<128x256xf32>
    %19 = tpu.matmul %17, %18, %cst_9 {dimension_numbers = #tpu.dot_dimension_numbers<[1], [0], [0], [1], [0, 0, 1, 1], [], []>} : vector<128x256xbf16>, vector<256x256xbf16>, vector<128x256xf32> -> vector<128x256xf32>
    %20 = arith.truncf %19 : vector<128x256xf32> to vector<128x256xbf16>
    %c0_10 = arith.constant 0 : index
    %c0_11 = arith.constant 0 : index
    %21 = vector.load %arg4[%c0_10, %c0_11] : memref<128x256xbf16, #tpu.memory_space<vmem>>, vector<128x256xbf16>
    tpu.vector_store %arg4[%c0_10, %c0_11], %20 {strides = array<i32>} : memref<128x256xbf16, #tpu.memory_space<vmem>>, vector<128x256xbf16>,
    return
  }
  func.func @transform_0(%arg0: i32) -> (i32, i32) {
    %c0_i32 = arith.constant 0 : i32
    %c0_i32_0 = arith.constant 0 : i32
    return %arg0, %c0_i32 : i32, i32
  }
  func.func @transform_1(%arg0: i32) -> (i32, i32) {
    %c0_i32 = arith.constant 0 : i32
    %c0_i32_0 = arith.constant 0 : i32
    %c0_i32_1 = arith.constant 0 : i32
    return %c0_i32, %c0_i32_0 : i32, i32
  }
  func.func @transform_2(%arg0: i32) -> (i32, i32) {
    %c0_i32 = arith.constant 0 : i32
    %c0_i32_0 = arith.constant 0 : i32
    %c0_i32_1 = arith.constant 0 : i32
    return %c0_i32, %c0_i32_0 : i32, i32
  }
  func.func @transform_3(%arg0: i32) -> (i32, i32) {
    %c0_i32 = arith.constant 0 : i32
    %c0_i32_0 = arith.constant 0 : i32
    return %arg0, %c0_i32 : i32, i32
  }
}

</mosaic_0001>

<bundles_post_ra>
// kernel: tpu_custom_call.1
= control target key start
LH: loop header
LB: loop body
LE: loop exit
PB: predicated region body
PF: predicated region fallthrough
CT: control target
= control target key end

     0   :  { %8 = vsyncpa [#allocation3], 0  ;;  %s1665_s0 = inlined_call_operand.hbm [shape: f32[128,128], index: 0, kind: input, shape index: {}]   ;;  %s1666_s1 = inlined_call_operand.hbm [shape: bf16[128,256], index: 1, kind: input, shape index: {}]   ;;  %s1667_s2 = inlined_call_operand.hbm [shape: bf16[256,256], index: 2, kind: input, shape index: {}]   ;;  %s1668_s3 = inlined_call_operand.hbm [shape: bf16[128,256], index: 3, kind: output, shape index: {}]  }
   0x1   :  { %9 = vsyncpa [#allocation6], 0 }
   0x2   :  { %10 = vsyncpa [#allocation4], 0  ;;  %s1378_s12 = smov [#allocation5]   ;;  %s1379_s14 = smov [#allocation2]  }
   0x3   :  { %s28_s13 = sshll.u32 %s1378_s12, 4  ;;  %s16_s15 = sshll.u32 %s1379_s14, 4  ;;  %s29_s13 = int_to_ptr.vmem [resolvable:$true] %s28_s13  ;;  %s1405_s15 = int_to_ptr.vmem [resolvable:$true] %s16_s15 }
   0x4   :  { %s1284_s18 = scalar_lea.hbm %s1666_s1, 2048 }
   0x5   :  { %p1285_p0 = scmp.ne.s32.totalorder %s1666_s1, %s1284_s18  ;;  %p1288_p1 = scmp.lt.u32.totalorder %s1284_s18, %s1666_s1 }
   0x7   :  { %p1290_p2 = pnand %p1288_p1, %p1285_p0 }
   0x9   :  { %1293 = shalt.err (!%p1290_p2)
}
   0xa   :  { %s1294_s23 = scalar_lea.vmem %s29_s13, 2048  ;;  %p1299_p4 = scmp.lt.s32.totalorder %s29_s13, %s29_s13 }
   0xb   :  { %p1295_p3 = scmp.ne.s32.totalorder %s29_s13, %s1294_s23  ;;  %p1300_p5 = scmp.lt.s32.totalorder %s1294_s23, %s1294_s23 }
   0xd   :  { %p1301_p6 = por %p1300_p5, %p1299_p4 }
   0xf   :  { %p1302_p7 = pnand %p1301_p6, %p1295_p3 }
  0x11   :  { %1305 = shalt.err (!%p1302_p7)
}
  0x12   :  { %s1380_s24 = smov 128   ;;  %s1381_s25 = smov 8  }
  0x13   :  { %34 = dma.hbm_to_vmem [thread:$0]  %s1666_s1, 2048, %s29_s13, [#allocation6], %s1380_s24, %s1380_s24, %s1381_s25  }
  0x14   :  { %s1306_s30 = scalar_lea.hbm %s1665_s0, 2048 }
  0x15   :  { %p1307_p8 = scmp.ne.s32.totalorder %s1665_s0, %s1306_s30  ;;  %p1310_p9 = scmp.lt.u32.totalorder %s1306_s30, %s1665_s0 }
  0x17   :  { %p1312_p10 = pnand %p1310_p9, %p1307_p8 }
  0x19   :  { %1315 = shalt.err (!%p1312_p10)
}
  0x1a   :  { %s1316_s8 = scalar_lea.vmem %s1405_s15, 2048  ;;  %p1321_p12 = scmp.lt.s32.totalorder %s1405_s15, %s1405_s15 }
  0x1b   :  { %p1317_p11 = scmp.ne.s32.totalorder %s1405_s15, %s1316_s8  ;;  %p1322_p13 = scmp.lt.s32.totalorder %s1316_s8, %s1316_s8 }
  0x1d   :  { %p1323_p0 = por %p1322_p13, %p1321_p12 }
  0x1f   :  { %p1324_p1 = pnand %p1323_p0, %p1317_p11 }
  0x21   :  { %1327 = shalt.err (!%p1324_p1)
}
  0x22   :  { %22 = dma.hbm_to_vmem [thread:$0]  %s1665_s0, 2048, %s1405_s15, [#allocation3], %s1380_s24, %s1380_s24, %s1381_s25  }
  0x23   :  { %s1382_s10 = smov [#allocation7]   ;;  %s1328_s14 = scalar_lea.hbm %s1667_s2, 4096 }
  0x24   :  { %s40_s11 = sshll.u32 %s1382_s10, 4  ;;  %p1329_p2 = scmp.ne.s32.totalorder %s1667_s2, %s1328_s14  ;;  %s41_s11 = int_to_ptr.vmem [resolvable:$true] %s40_s11 }
  0x25   :  { %p1332_p3 = scmp.lt.u32.totalorder %s1328_s14, %s1667_s2 }
  0x27   :  { %p1334_p4 = pnand %p1332_p3, %p1329_p2 }
  0x29   :  { %1337 = shalt.err (!%p1334_p4)
}
  0x2a   :  { %s1338_s20 = scalar_lea.vmem %s41_s11, 4096  ;;  %p1343_p6 = scmp.lt.s32.totalorder %s41_s11, %s41_s11 }
  0x2b   :  { %p1339_p5 = scmp.ne.s32.totalorder %s41_s11, %s1338_s20  ;;  %p1344_p7 = scmp.lt.s32.totalorder %s1338_s20, %s1338_s20 }
  0x2d   :  { %p1345_p8 = por %p1344_p7, %p1343_p6 }
  0x2f   :  { %p1346_p9 = pnand %p1345_p8, %p1339_p5 }
  0x31   :  { %1349 = shalt.err (!%p1346_p9)
}
  0x32   :  { %46 = dma.hbm_to_vmem [thread:$0]  %s1667_s2, 4096, %s41_s11, [#allocation6], %s1380_s24, %s1380_s24, %s1381_s25  }
  0x33   :  { %1372 = dma.done.wait [#allocation3], 2048  }
  0x34   :  { %1373 = vsyncadd [#allocation3], 4294965248 }
  0x35   :  { %1374 = dma.done.wait [#allocation6], 6144  }
  0x36   :  { %1375 = vsyncadd [#allocation6], 4294961152  ;;  %v1383_v0 = vmov 0   ;;  %v1148_v1 = vld [vmem:[#allocation5 + $0x4] ss:$8 sps:$4 sm:$0xff]   ;;  %v59_v30 = vld [vmem:[#allocation2 + $0x10] sm:$0xff] }
  0x37   :  { %209 = vmatprep.mubr.bf16.mxu0 %v1383_v0  ;;  %v1150_v2 = vld [vmem:[#allocation5] ss:$8 sps:$4 sm:$0xff]   ;;  %177 = vmatprep.subr.bf16.mxu0 %v1148_v1  ;;  %v1151_v3 = vld [vmem:[#allocation5 + $0x14] ss:$8 sps:$4 sm:$0xff]   ;;  %v1153_v4 = vld [vmem:[#allocation5 + $0x10] ss:$8 sps:$4 sm:$0xff]  }
  0x38   :  { %178 = vmatpush1.bf16.msra.mxu0 %v1150_v2  ;;  %v1154_v5 = vld [vmem:[#allocation5 + $0x24] ss:$8 sps:$4 sm:$0xff]   ;;  %v1156_v6 = vld [vmem:[#allocation5 + $0x20] ss:$8 sps:$4 sm:$0xff]   ;;  %v1157_v7 = vld [vmem:[#allocation5 + $0x34] ss:$8 sps:$4 sm:$0xff]  }
  0x39   :  { %179 = vmatprep.subr.bf16.mxu0 %v1151_v3  ;;  %v1159_v8 = vld [vmem:[#allocation5 + $0x30] ss:$8 sps:$4 sm:$0xff]   ;;  %v1160_v9 = vld [vmem:[#allocation5 + $0x44] ss:$8 sps:$4 sm:$0xff]   ;;  %v1162_v10 = vld [vmem:[#allocation5 + $0x40] ss:$8 sps:$4 sm:$0xff]  }
  0x3a   :  { %v1163_v11 = vld [vmem:[#allocation5 + $0x54] ss:$8 sps:$4 sm:$0xff]   ;;  %v1174_v12 = vld [vmem:[#allocation7 + $0x4] ss:$8 sps:$4 sm:$0xff]   ;;  %v1172_v13 = vld [vmem:[#allocation7] ss:$8 sps:$4 sm:$0xff]  }
  0x3b   :  { %v1165_v14 = vld [vmem:[#allocation5 + $0x50] ss:$8 sps:$4 sm:$0xff]   ;;  %v1177_v15 = vld [vmem:[#allocation7 + $0x14] ss:$8 sps:$4 sm:$0xff]   ;;  %1109 = vmatprep.subr.bf16.mxu1 %v1174_v12  ;;  %v1166_v16 = vld [vmem:[#allocation5 + $0x64] ss:$8 sps:$4 sm:$0xff]  }
  0x3c   :  { %180 = vmatpush1.bf16.msra.mxu0 %v1153_v4  ;;  %1125 = vmatpush1.bf16.msra.mxu1 %v1172_v13  ;;  %v1175_v17 = vld [vmem:[#allocation7 + $0x10] ss:$8 sps:$4 sm:$0xff]   ;;  %v1168_v18 = vld [vmem:[#allocation5 + $0x60] ss:$8 sps:$4 sm:$0xff]   ;;  %v1180_v19 = vld [vmem:[#allocation7 + $0x24] ss:$8 sps:$4 sm:$0xff]  }
  0x3d   :  { %181 = vmatprep.subr.bf16.mxu0 %v1154_v5  ;;  %1110 = vmatprep.subr.bf16.mxu1 %v1177_v15  ;;  %v1169_v20 = vld [vmem:[#allocation5 + $0x74] ss:$8 sps:$4 sm:$0xff]   ;;  %v1171_v21 = vld [vmem:[#allocation5 + $0x70] ss:$8 sps:$4 sm:$0xff]   ;;  %v57_v22 = vld [vmem:[#allocation2] sm:$0xff]  ;;  %s1384_s2 = smov [#allocation8]  }
  0x3e   :  { %v58_v23 = vld [vmem:[#allocation2 + $0x8] sm:$0xff]  ;;  %v1183_v25 = vld [vmem:[#allocation7 + $0x34] ss:$8 sps:$4 sm:$0xff]   ;;  %v1181_v26 = vld [vmem:[#allocation7 + $0x30] ss:$8 sps:$4 sm:$0xff]   ;;  %s1016_s21 = sshll.u32 %s1384_s2, 4  ;;  %s1017_s21 = int_to_ptr.vmem [resolvable:$true] %s1016_s21 }
  0x3f   :  { %v1178_v24 = vld [vmem:[#allocation7 + $0x20] ss:$8 sps:$4 sm:$0xff]   ;;  %v1186_v27 = vld [vmem:[#allocation7 + $0x44] ss:$8 sps:$4 sm:$0xff]   ;;  %v73_v28 = vpack.c.bf16 %v58_v23, %v57_v22  ;;  %v60_v31 = vld [vmem:[#allocation2 + $0x18] sm:$0xff]  ;;  %s1350_s22 = scalar_lea.vmem %s1017_s21, 2048  ;;  %p1355_p11 = scmp.lt.s32.totalorder %s1017_s21, %s1017_s21 }
  0x40   :  { %182 = vmatpush1.bf16.msra.mxu0 %v1156_v6  ;;  %1126 = vmatpush1.bf16.msra.mxu1 %v1175_v17  ;;  %v1184_v29 = vld [vmem:[#allocation7 + $0x40] ss:$8 sps:$4 sm:$0xff]   ;;  %v1189_v32 = vld [vmem:[#allocation7 + $0x54] ss:$8 sps:$4 sm:$0xff]   ;;  %v74_v33 = vpack.c.bf16 %v60_v31, %v59_v30  ;;  %v1187_v34 = vld [vmem:[#allocation7 + $0x50] ss:$8 sps:$4 sm:$0xff]   ;;  %p1351_p10 = scmp.ne.s32.totalorder %s1017_s21, %s1350_s22  ;;  %p1356_p12 = scmp.lt.s32.totalorder %s1350_s22, %s1350_s22 }
  0x41   :  { %183 = vmatprep.subr.bf16.mxu0 %v1157_v7  ;;  %1111 = vmatprep.subr.bf16.mxu1 %v1180_v19  ;;  %v1192_v35 = vld [vmem:[#allocation7 + $0x64] ss:$8 sps:$4 sm:$0xff]   ;;  %v1190_v36 = vld [vmem:[#allocation7 + $0x60] ss:$8 sps:$4 sm:$0xff]   ;;  %v1195_v39 = vld [vmem:[#allocation7 + $0x74] ss:$8 sps:$4 sm:$0xff]  }
  0x42   :  { %v61_v37 = vld [vmem:[#allocation2 + $0x20] sm:$0xff]  ;;  %v62_v38 = vld [vmem:[#allocation2 + $0x28] sm:$0xff]  ;;  %v1193_v41 = vld [vmem:[#allocation7 + $0x70] ss:$8 sps:$4 sm:$0xff]   ;;  %p1357_p13 = por %p1356_p12, %p1355_p11 }
  0x43   :  { %v75_v40 = vpack.c.bf16 %v62_v38, %v61_v37  ;;  %v63_v42 = vld [vmem:[#allocation2 + $0x30] sm:$0xff]  ;;  %v64_v43 = vld [vmem:[#allocation2 + $0x38] sm:$0xff]  ;;  %v65_v45 = vld [vmem:[#allocation2 + $0x40] sm:$0xff] }
  0x44   :  { %184 = vmatpush1.bf16.msra.mxu0 %v1159_v8  ;;  %1127 = vmatpush1.bf16.msra.mxu1 %v1178_v24  ;;  %v76_v44 = vpack.c.bf16 %v64_v43, %v63_v42  ;;  %v66_v46 = vld [vmem:[#allocation2 + $0x48] sm:$0xff]  ;;  %v67_v48 = vld [vmem:[#allocation2 + $0x50] sm:$0xff]  ;;  %v68_v49 = vld [vmem:[#allocation2 + $0x58] sm:$0xff]  ;;  %p1358_p0 = pnand %p1357_p13, %p1351_p10 }
  0x45   :  { %185 = vmatprep.subr.bf16.mxu0 %v1160_v9  ;;  %1112 = vmatprep.subr.bf16.mxu1 %v1183_v25  ;;  %v77_v47 = vpack.c.bf16 %v66_v46, %v65_v45  ;;  %v78_v50 = vpack.c.bf16 %v68_v49, %v67_v48  ;;  %v69_v51 = vld [vmem:[#allocation2 + $0x60] sm:$0xff]  ;;  %v70_v52 = vld [vmem:[#allocation2 + $0x68] sm:$0xff]  ;;  %v71_v54 = vld [vmem:[#allocation2 + $0x70] sm:$0xff] }
  0x46   :  { %v79_v53 = vpack.c.bf16 %v70_v52, %v69_v51  ;;  %v72_v55 = vld [vmem:[#allocation2 + $0x78] sm:$0xff]  ;;  %v1198_v57 = vld [vmem:[#allocation7 + $0x84] ss:$8 sps:$4 sm:$0xff]   ;;  %v1196_v58 = vld [vmem:[#allocation7 + $0x80] ss:$8 sps:$4 sm:$0xff]  }
  0x47   :  { %v80_v56 = vpack.c.bf16 %v72_v55, %v71_v54  ;;  %v1201_v59 = vld [vmem:[#allocation7 + $0x94] ss:$8 sps:$4 sm:$0xff]   ;;  %v1199_v60 = vld [vmem:[#allocation7 + $0x90] ss:$8 sps:$4 sm:$0xff]   ;;  %v1204_v61 = vld [vmem:[#allocation7 + $0xa4] ss:$8 sps:$4 sm:$0xff]  }
  0x48   :  { %186 = vmatpush1.bf16.msra.mxu0 %v1162_v10  ;;  %1128 = vmatpush1.bf16.msra.mxu1 %v1181_v26  ;;  %v1202_v62 = vld [vmem:[#allocation7 + $0xa0] ss:$8 sps:$4 sm:$0xff]   ;;  %v1207_v63 = vld [vmem:[#allocation7 + $0xb4] ss:$8 sps:$4 sm:$0xff]   ;;  %v1210_v1 = vld [vmem:[#allocation7 + $0xc4] ss:$8 sps:$4 sm:$0xff]  }
  0x49   :  { %187 = vmatprep.subr.bf16.mxu0 %v1163_v11  ;;  %1113 = vmatprep.subr.bf16.mxu1 %v1186_v27  ;;  %v1208_v2 = vld [vmem:[#allocation7 + $0xc0] ss:$8 sps:$4 sm:$0xff]   ;;  %v1213_v3 = vld [vmem:[#allocation7 + $0xd4] ss:$8 sps:$4 sm:$0xff]   ;;  %v1211_v4 = vld [vmem:[#allocation7 + $0xd0] ss:$8 sps:$4 sm:$0xff]  }
  0x4a   :  { %v1216_v5 = vld [vmem:[#allocation7 + $0xe4] ss:$8 sps:$4 sm:$0xff]   ;;  %v1214_v6 = vld [vmem:[#allocation7 + $0xe0] ss:$8 sps:$4 sm:$0xff]   ;;  %v1219_v7 = vld [vmem:[#allocation7 + $0xf4] ss:$8 sps:$4 sm:$0xff]  }
  0x4b   :  { %v1217_v8 = vld [vmem:[#allocation7 + $0xf0] ss:$8 sps:$4 sm:$0xff]  }
  0x4c   :  { %188 = vmatpush1.bf16.msra.mxu0 %v1165_v14  ;;  %1129 = vmatpush1.bf16.msra.mxu1 %v1184_v29 }
  0x4d   :  { %189 = vmatprep.subr.bf16.mxu0 %v1166_v16  ;;  %1114 = vmatprep.subr.bf16.mxu1 %v1189_v32 }
  0x50   :  { %190 = vmatpush1.bf16.msra.mxu0 %v1168_v18  ;;  %1130 = vmatpush1.bf16.msra.mxu1 %v1187_v34 }
  0x51   :  { %191 = vmatprep.subr.bf16.mxu0 %v1169_v20  ;;  %1115 = vmatprep.subr.bf16.mxu1 %v1192_v35 }
  0x54   :  { %192 = vmatpush1.bf16.msra.mxu0 %v1171_v21  ;;  %1131 = vmatpush1.bf16.msra.mxu1 %v1190_v36 }
  0x55   :  { %786 = vmatprep.subr.bf16.mxu0 %v1174_v12  ;;  %1116 = vmatprep.subr.bf16.mxu1 %v1195_v39 }
  0x57   :  { %210 = vmatmul.mubr.bf16.vlgmr.msra.gmra.mrb[0].mxu0 %v73_v28 }
  0x58   :  { %219 = vmatprep.mubr.bf16.mxu0 %v1383_v0  ;;  %787 = vmatpush1.bf16.msra.mxu0 %v1172_v13 }
  0x59   :  { %788 = vmatprep.subr.bf16.mxu0 %v1177_v15  ;;  %1132 = vmatpush1.bf16.msra.mxu1 %v1193_v41 }
  0x5a   :  { %1117 = vmatprep.subr.bf16.mxu1 %v1198_v57 }
  0x5c   :  { %789 = vmatpush1.bf16.msra.mxu0 %v1175_v17 }
  0x5d   :  { %790 = vmatprep.subr.bf16.mxu0 %v1180_v19  ;;  %1133 = vmatpush1.bf16.msra.mxu1 %v1196_v58 }
  0x5e   :  { %1118 = vmatprep.subr.bf16.mxu1 %v1201_v59 }
  0x5f   :  { %220 = vmatmul.mubr.bf16.gmra.mrb[4].mxu0 %v74_v33 }
  0x60   :  { %229 = vmatprep.mubr.bf16.mxu0 %v1383_v0  ;;  %791 = vmatpush1.bf16.msra.mxu0 %v1178_v24 }
  0x61   :  { %792 = vmatprep.subr.bf16.mxu0 %v1183_v25  ;;  %1134 = vmatpush1.bf16.msra.mxu1 %v1199_v60 }
  0x62   :  { %1119 = vmatprep.subr.bf16.mxu1 %v1204_v61 }
  0x64   :  { %793 = vmatpush1.bf16.msra.mxu0 %v1181_v26 }
  0x65   :  { %794 = vmatprep.subr.bf16.mxu0 %v1186_v27  ;;  %1135 = vmatpush1.bf16.msra.mxu1 %v1202_v62 }
  0x66   :  { %1120 = vmatprep.subr.bf16.mxu1 %v1207_v63 }
  0x67   :  { %230 = vmatmul.mubr.bf16.gmra.mrb[8].mxu0 %v75_v40 }
  0x68   :  { %239 = vmatprep.mubr.bf16.mxu0 %v1383_v0  ;;  %795 = vmatpush1.bf16.msra.mxu0 %v1184_v29 }
  0x69   :  { %796 = vmatprep.subr.bf16.mxu0 %v1189_v32 }
  0x6c   :  { %797 = vmatpush1.bf16.msra.mxu0 %v1187_v34 }
  0x6d   :  { %798 = vmatprep.subr.bf16.mxu0 %v1192_v35 }
  0x6f   :  { %240 = vmatmul.mubr.bf16.gmra.mrb[12].mxu0 %v76_v44 }
  0x70   :  { %249 = vmatprep.mubr.bf16.mxu0 %v1383_v0  ;;  %799 = vmatpush1.bf16.msra.mxu0 %v1190_v36 }
  0x71   :  { %800 = vmatprep.subr.bf16.mxu0 %v1195_v39 }
  0x74   :  { %801 = vmatpush1.bf16.msra.mxu0 %v1193_v41 }
  0x75   :  { %802 = vmatprep.subr.bf16.mxu0 %v1198_v57 }
  0x77   :  { %250 = vmatmul.mubr.bf16.gmra.mrb[16].mxu0 %v77_v47 }
  0x78   :  { %259 = vmatprep.mubr.bf16.mxu0 %v1383_v0  ;;  %803 = vmatpush1.bf16.msra.mxu0 %v1196_v58 }
  0x79   :  { %804 = vmatprep.subr.bf16.mxu0 %v1201_v59 }
  0x7c   :  { %805 = vmatpush1.bf16.msra.mxu0 %v1199_v60 }
  0x7d   :  { %806 = vmatprep.subr.bf16.mxu0 %v1204_v61 }
  0x7f   :  { %260 = vmatmul.mubr.bf16.gmra.mrb[20].mxu0 %v78_v50 }
  0x80   :  { %269 = vmatprep.mubr.bf16.mxu0 %v1383_v0  ;;  %807 = vmatpush1.bf16.msra.mxu0 %v1202_v62 }
  0x81   :  { %808 = vmatprep.subr.bf16.mxu0 %v1207_v63 }
  0x87   :  { %270 = vmatmul.mubr.bf16.gmra.mrb[24].mxu0 %v79_v53 }
  0x88   :  { %279 = vmatprep.mubr.bf16.mxu0 %v1383_v0  ;;  %v1205_v0 = vld [vmem:[#allocation7 + $0xb0] ss:$8 sps:$4 sm:$0xff]  }
  0x89   :  { %809 = vmatpush1.bf16.msra.mxu0 %v1205_v0  ;;  %1136 = vmatpush1.bf16.msra.mxu1 %v1205_v0 }
  0x8a   :  { %810 = vmatprep.subr.bf16.mxu0 %v1210_v1  ;;  %1121 = vmatprep.subr.bf16.mxu1 %v1210_v1 }
  0x8d   :  { %811 = vmatpush1.bf16.msra.mxu0 %v1208_v2  ;;  %1137 = vmatpush1.bf16.msra.mxu1 %v1208_v2 }
  0x8e   :  { %812 = vmatprep.subr.bf16.mxu0 %v1213_v3  ;;  %1122 = vmatprep.subr.bf16.mxu1 %v1213_v3 }
  0x8f   :  { %280 = vmatmul.mubr.bf16.gmra.mrb[28].mxu0 %v80_v56 }
  0x91   :  { %813 = vmatpush1.bf16.msra.mxu0 %v1211_v4  ;;  %1138 = vmatpush1.bf16.msra.mxu1 %v1211_v4 }
  0x92   :  { %814 = vmatprep.subr.bf16.mxu0 %v1216_v5  ;;  %1123 = vmatprep.subr.bf16.mxu1 %v1216_v5 }
  0x95   :  { %815 = vmatpush1.bf16.msra.mxu0 %v1214_v6  ;;  %1139 = vmatpush1.bf16.msra.mxu1 %v1214_v6 }
  0x96   :  { %816 = vmatprep.subr.bf16.mxu0 %v1219_v7  ;;  %1124 = vmatprep.subr.bf16.mxu1 %v1219_v7 }
  0x99   :  { %817 = vmatpush1.bf16.msra.mxu0 %v1217_v8  ;;  %1140 = vmatpush1.bf16.msra.mxu1 %v1217_v8 }
 0x12a   :  { %v211_v9 = vpop.f32.mrb[0].mxu0 }
 0x12b   :  { %v322_v10 = vmul.f32 0.044715, %v211_v9  ;;  %v213_v11 = vpop.f32.mrb[1].mxu0  ;;  %v1465_v28 = vmul.f32 0.5, %v211_v9 }
 0x12c   :  { %v323_v12 = vmul.f32 0.044715, %v213_v11  ;;  %v215_v13 = vpop.f32.mrb[2].mxu0  ;;  %v1467_v37 = vmul.f32 0.5, %v213_v11 }
 0x12d   :  { %v354_v14 = vmul.f32 %v322_v10, %v211_v9  ;;  %v324_v15 = vmul.f32 0.044715, %v215_v13  ;;  %v217_v16 = vpop.f32.mrb[3].mxu0  ;;  %v292_v45 = vmul.f32 0.5, %v215_v13 }
 0x12e   :  { %v355_v17 = vmul.f32 %v323_v12, %v213_v11  ;;  %v325_v18 = vmul.f32 0.044715, %v217_v16  ;;  %v1469_v50 = vmul.f32 0.5, %v217_v16 }
 0x12f   :  { %v386_v19 = vmul.f32 %v354_v14, %v211_v9  ;;  %v356_v20 = vmul.f32 %v324_v15, %v215_v13 }
 0x130   :  { %v387_v21 = vmul.f32 %v355_v17, %v213_v11  ;;  %v357_v22 = vmul.f32 %v325_v18, %v217_v16 }
 0x131   :  { %v418_v23 = vadd.f32 %v386_v19, %v211_v9  ;;  %v388_v24 = vmul.f32 %v356_v20, %v215_v13 }
 0x132   :  { %v419_v25 = vadd.f32 %v387_v21, %v213_v11  ;;  %v389_v26 = vmul.f32 %v357_v22, %v217_v16  ;;  %v221_v27 = vpop.f32.mrb[4].mxu0 }
 0x133   :  { %v450_v29 = vmul.f32 0.7978846, %v418_v23  ;;  %v420_v30 = vadd.f32 %v388_v24, %v215_v13  ;;  %v326_v31 = vmul.f32 0.044715, %v221_v27  ;;  %v223_v32 = vpop.f32.mrb[5].mxu0  ;;  %v1473_v54 = vmul.f32 0.5, %v221_v27 }
 0x134   :  { %v451_v33 = vmul.f32 0.7978846, %v419_v25  ;;  %v421_v34 = vadd.f32 %v389_v26, %v217_v16  ;;  %v327_v35 = vmul.f32 0.044715, %v223_v32  ;;  %v225_v36 = vpop.f32.mrb[6].mxu0  ;;  %v1471_v53 = vmul.f32 0.5, %v223_v32 }
 0x135   :  { %1220 = vtanh.f32 %v450_v29  ;;  %v452_v38 = vmul.f32 0.7978846, %v420_v30  ;;  %v358_v39 = vmul.f32 %v326_v31, %v221_v27  ;;  %v328_v40 = vmul.f32 0.044715, %v225_v36  ;;  %v227_v41 = vpop.f32.mrb[7].mxu0 }
 0x136   :  { %1222 = vtanh.f32 %v451_v33  ;;  %v453_v42 = vmul.f32 0.7978846, %v421_v34  ;;  %v359_v43 = vmul.f32 %v327_v35, %v223_v32  ;;  %v329_v44 = vmul.f32 0.044715, %v227_v41 }
 0x137   :  { %1224 = vtanh.f32 %v452_v38  ;;  %v390_v46 = vmul.f32 %v358_v39, %v221_v27  ;;  %v360_v47 = vmul.f32 %v328_v40, %v225_v36  ;;  %v1475_v58 = vmul.f32 0.5, %v227_v41 }
 0x138   :  { %1226 = vtanh.f32 %v453_v42  ;;  %v391_v48 = vmul.f32 %v359_v43, %v223_v32  ;;  %v361_v49 = vmul.f32 %v329_v44, %v227_v41  ;;  %v1477_v59 = vmul.f32 0.5, %v225_v36 }
 0x139   :  { %v422_v51 = vadd.f32 %v390_v46, %v221_v27  ;;  %v392_v52 = vmul.f32 %v360_v47, %v225_v36 }
 0x13a   :  { %v423_v55 = vadd.f32 %v391_v48, %v223_v32  ;;  %v393_v56 = vmul.f32 %v361_v49, %v227_v41  ;;  %v231_v57 = vpop.f32.mrb[8].mxu0 }
 0x13b   :  { %v454_v60 = vmul.f32 0.7978846, %v422_v51  ;;  %v424_v61 = vadd.f32 %v392_v52, %v225_v36  ;;  %v330_v62 = vmul.f32 0.044715, %v231_v57  ;;  %v233_v63 = vpop.f32.mrb[9].mxu0  ;;  %v1479_v0 = vmul.f32 0.5, %v231_v57 }
 0x13c   :  { %v455_v1 = vmul.f32 0.7978846, %v423_v55  ;;  %v425_v2 = vadd.f32 %v393_v56, %v227_v41  ;;  %v331_v3 = vmul.f32 0.044715, %v233_v63  ;;  %v235_v4 = vpop.f32.mrb[10].mxu0  ;;  %v1481_v5 = vmul.f32 0.5, %v233_v63 }
 0x13d   :  { %1228 = vtanh.f32 %v454_v60  ;;  %v456_v6 = vmul.f32 0.7978846, %v424_v61  ;;  %v362_v7 = vmul.f32 %v330_v62, %v231_v57  ;;  %v332_v8 = vmul.f32 0.044715, %v235_v4  ;;  %v237_v9 = vpop.f32.mrb[11].mxu0 }
 0x13e   :  { %1230 = vtanh.f32 %v455_v1  ;;  %v457_v10 = vmul.f32 0.7978846, %v425_v2  ;;  %v363_v11 = vmul.f32 %v331_v3, %v233_v63  ;;  %v333_v12 = vmul.f32 0.044715, %v237_v9 }
 0x13f   :  { %v1221_v13 = vpop.eup %1220  ;;  %1232 = vtanh.f32 %v456_v6  ;;  %v394_v14 = vmul.f32 %v362_v7, %v231_v57  ;;  %v364_v15 = vmul.f32 %v332_v8, %v235_v4  ;;  %v1483_v16 = vmul.f32 0.5, %v237_v9 }
 0x140   :  { %v1223_v17 = vpop.eup %1222  ;;  %v514_v18 = vadd.f32 1.0, %v1221_v13  ;;  %1234 = vtanh.f32 %v457_v10  ;;  %v395_v19 = vmul.f32 %v363_v11, %v233_v63  ;;  %v365_v20 = vmul.f32 %v333_v12, %v237_v9 }
 0x141   :  { %v1225_v21 = vpop.eup %1224  ;;  %v426_v22 = vadd.f32 %v394_v14, %v231_v57  ;;  %v396_v23 = vmul.f32 %v364_v15, %v235_v4  ;;  %v515_v24 = vadd.f32 1.0, %v1223_v17  ;;  %v1485_v25 = vmul.f32 0.5, %v235_v4 }
 0x142   :  { %v1227_v26 = vpop.eup %1226  ;;  %v546_v27 = vmul.f32 %v514_v18, %v1465_v28  ;;  %v516_v29 = vadd.f32 1.0, %v1225_v21  ;;  %v397_v30 = vmul.f32 %v365_v20, %v237_v9  ;;  %v1488_v31 = vpop.f32.mrb[12].mxu0  ;;  %v427_v32 = vadd.f32 %v395_v19, %v233_v63 }
 0x143   :  { %v458_v33 = vmul.f32 0.7978846, %v426_v22  ;;  %v428_v34 = vadd.f32 %v396_v23, %v235_v4  ;;  %v334_v35 = vmul.f32 0.044715, %v1488_v31  ;;  %v1491_v36 = vpop.f32.mrb[13].mxu0  ;;  %v517_v38 = vadd.f32 1.0, %v1227_v26 }
 0x144   :  { %v548_v39 = vmul.f32 %v516_v29, %v292_v45  ;;  %v335_v40 = vmul.f32 0.044715, %v1491_v36  ;;  %v1494_v41 = vpop.f32.mrb[14].mxu0  ;;  %v547_v42 = vmul.f32 %v515_v24, %v1467_v37  ;;  %v429_v28 = vadd.f32 %v397_v30, %v237_v9 }
 0x145   :  { %1236 = vtanh.f32 %v458_v33  ;;  %v460_v43 = vmul.f32 0.7978846, %v428_v34  ;;  %v366_v44 = vmul.f32 %v334_v35, %v1488_v31  ;;  %v336_v46 = vmul.f32 0.044715, %v1494_v41  ;;  %v1499_v47 = vpop.f32.mrb[15].mxu0 }
 0x146   :  { %v367_v48 = vmul.f32 %v335_v40, %v1491_v36  ;;  %v337_v49 = vmul.f32 0.044715, %v1499_v47  ;;  %v549_v45 = vmul.f32 %v517_v38, %v1469_v50  ;;  %v578_v51 = vpack.c.bf16 %v548_v39, %v546_v27 }
 0x147   :  { %v1229_v52 = vpop.eup %1228  ;;  %1238 = vtanh.f32 %v460_v43  ;;  %v398_v37 = vmul.f32 %v366_v44, %v1488_v31  ;;  %v368_v55 = vmul.f32 %v336_v46, %v1494_v41  ;;  %v459_v56 = vmul.f32 0.7978846, %v427_v32 }
 0x148   :  { %v1231_v57 = vpop.eup %1230  ;;  %v399_v60 = vmul.f32 %v367_v48, %v1491_v36  ;;  %v369_v61 = vmul.f32 %v337_v49, %v1499_v47  ;;  %v579_v62 = vpack.c.bf16 %v549_v45, %v547_v42  ;;  %v518_v63 = vadd.f32 1.0, %v1229_v52 }
 0x149   :  { %v1233_v1 = vpop.eup %1232  ;;  %v430_v2 = vadd.f32 %v398_v37, %v1488_v31  ;;  %v400_v50 = vmul.f32 %v368_v55, %v1494_v41  ;;  %v519_v3 = vadd.f32 1.0, %v1231_v57  ;;  %v461_v4 = vmul.f32 0.7978846, %v429_v28 }
 0x14a   :  { %v1235_v6 = vpop.eup %1234  ;;  %v431_v7 = vadd.f32 %v399_v60, %v1491_v36  ;;  %v401_v8 = vmul.f32 %v369_v61, %v1499_v47  ;;  %818 = vmatprep.mubr.bf16.mxu0 %v579_v62  ;;  %v1512_v9 = vpop.f32.mrb[16].mxu0  ;;  %v520_v10 = vadd.f32 1.0, %v1233_v1  ;;  %v550_v11 = vmul.f32 %v518_v63, %v1473_v54 }
 0x14b   :  { %v462_v12 = vmul.f32 0.7978846, %v430_v2  ;;  %v432_v13 = vadd.f32 %v400_v50, %v1494_v41  ;;  %v338_v14 = vmul.f32 0.044715, %v1512_v9  ;;  %819 = vmatmul.mubr.bf16.vlgmr.msra.gmra.mrb[32].mxu0 %v578_v51  ;;  %v1517_v15 = vpop.f32.mrb[17].mxu0  ;;  %v521_v17 = vadd.f32 1.0, %v1235_v6 }
 0x14c   :  { %v463_v18 = vmul.f32 0.7978846, %v431_v7  ;;  %v433_v19 = vadd.f32 %v401_v8, %v1499_v47  ;;  %v339_v20 = vmul.f32 0.044715, %v1517_v15  ;;  %v1521_v21 = vpop.f32.mrb[18].mxu0  ;;  %v551_v22 = vmul.f32 %v519_v3, %v1471_v53 }
 0x14d   :  { %1240 = vtanh.f32 %v462_v12  ;;  %v464_v54 = vmul.f32 0.7978846, %v432_v13  ;;  %v370_v23 = vmul.f32 %v338_v14, %v1512_v9  ;;  %v340_v24 = vmul.f32 0.044715, %v1521_v21  ;;  %v1526_v26 = vpop.f32.mrb[19].mxu0 }
 0x14e   :  { %1242 = vtanh.f32 %v463_v18  ;;  %v465_v27 = vmul.f32 0.7978846, %v433_v19  ;;  %v371_v29 = vmul.f32 %v339_v20, %v1517_v15  ;;  %v341_v30 = vmul.f32 0.044715, %v1526_v26 }
 0x14f   :  { %v1237_v32 = vpop.eup %1236  ;;  %1244 = vtanh.f32 %v464_v54  ;;  %v402_v33 = vmul.f32 %v370_v23, %v1512_v9  ;;  %v372_v53 = vmul.f32 %v340_v24, %v1521_v21  ;;  %v553_v34 = vmul.f32 %v521_v17, %v1475_v58 }
 0x150   :  { %1246 = vtanh.f32 %v465_v27  ;;  %v403_v35 = vmul.f32 %v371_v29, %v1517_v15  ;;  %v373_v38 = vmul.f32 %v341_v30, %v1526_v26  ;;  %v552_v39 = vmul.f32 %v520_v10, %v1477_v59 }
 0x151   :  { %v1239_v40 = vpop.eup %1238  ;;  %v434_v42 = vadd.f32 %v402_v33, %v1512_v9  ;;  %v404_v28 = vmul.f32 %v372_v53, %v1521_v21  ;;  %v581_v43 = vpack.c.bf16 %v553_v34, %v551_v22  ;;  %1248 = vtanh.f32 %v459_v56 }
 0x152   :  { %v435_v44 = vadd.f32 %v403_v35, %v1517_v15  ;;  %v405_v46 = vmul.f32 %v373_v38, %v1526_v26  ;;  %v1540_v48 = vpop.f32.mrb[20].mxu0  ;;  %v580_v58 = vpack.c.bf16 %v552_v39, %v550_v11  ;;  %1250 = vtanh.f32 %v461_v4 }
 0x153   :  { %v466_v49 = vmul.f32 0.7978846, %v434_v42  ;;  %v436_v45 = vadd.f32 %v404_v28, %v1521_v21  ;;  %828 = vmatprep.mubr.bf16.mxu0 %v581_v43  ;;  %v342_v59 = vmul.f32 0.044715, %v1540_v48  ;;  %v1544_v51 = vpop.f32.mrb[21].mxu0  ;;  %v522_v52 = vadd.f32 1.0, %v1237_v32 }
 0x154   :  { %v467_v37 = vmul.f32 0.7978846, %v435_v44  ;;  %v437_v55 = vadd.f32 %v405_v46, %v1526_v26  ;;  %829 = vmatmul.mubr.bf16.gmra.mrb[36].mxu0 %v580_v58  ;;  %v343_v56 = vmul.f32 0.044715, %v1544_v51  ;;  %v1548_v57 = vpop.f32.mrb[22].mxu0  ;;  %v524_v60 = vadd.f32 1.0, %v1239_v40 }
 0x155   :  { %1252 = vtanh.f32 %v466_v49  ;;  %v468_v61 = vmul.f32 0.7978846, %v436_v45  ;;  %v374_v62 = vmul.f32 %v342_v59, %v1540_v48  ;;  %v344_v63 = vmul.f32 0.044715, %v1548_v57  ;;  %v1552_v1 = vpop.f32.mrb[23].mxu0 }
 0x156   :  { %1254 = vtanh.f32 %v467_v37  ;;  %v469_v2 = vmul.f32 0.7978846, %v437_v55  ;;  %v375_v50 = vmul.f32 %v343_v56, %v1544_v51  ;;  %v345_v3 = vmul.f32 0.044715, %v1552_v1 }
 0x157   :  { %v1556_v4 = vpop.eup %1240  ;;  %1256 = vtanh.f32 %v468_v61  ;;  %v406_v6 = vmul.f32 %v374_v62, %v1540_v48  ;;  %v376_v7 = vmul.f32 %v344_v63, %v1548_v57  ;;  %v1561_v8 = vmul.f32 %v522_v52, %v1479_v0 }
 0x158   :  { %v1243_v10 = vpop.eup %1242  ;;  %1258 = vtanh.f32 %v469_v2  ;;  %v407_v11 = vmul.f32 %v375_v50, %v1544_v51  ;;  %v377_v12 = vmul.f32 %v345_v3, %v1552_v1  ;;  %v556_v13 = vmul.f32 %v524_v60, %v1485_v25 }
 0x159   :  { %v1245_v14 = vpop.eup %1244  ;;  %v438_v17 = vadd.f32 %v406_v6, %v1540_v48  ;;  %v408_v18 = vmul.f32 %v376_v7, %v1548_v57  ;;  %v303_v19 = vmul.f32 0.5, %v1491_v36  ;;  %v305_v20 = vmul.f32 0.5, %v1499_v47 }
 0x15a   :  { %v1247_v22 = vpop.eup %1246  ;;  %v439_v0 = vadd.f32 %v407_v11, %v1544_v51  ;;  %v409_v54 = vmul.f32 %v377_v12, %v1552_v1  ;;  %v1572_v23 = vpop.f32.mrb[24].mxu0  ;;  %v582_v24 = vpack.c.bf16 %v556_v13, %v1561_v8  ;;  %v527_v27 = vadd.f32 1.0, %v1243_v10 }
 0x15b   :  { %v1249_v25 = vpop.eup %1248  ;;  %v470_v29 = vmul.f32 0.7978846, %v438_v17  ;;  %v440_v30 = vadd.f32 %v408_v18, %v1548_v57  ;;  %v346_v32 = vmul.f32 0.044715, %v1572_v23  ;;  %v1577_v33 = vpop.f32.mrb[25].mxu0  ;;  %v529_v36 = vadd.f32 1.0, %v1247_v22 }
 0x15c   :  { %v1251_v47 = vpop.eup %1250  ;;  %v471_v53 = vmul.f32 0.7978846, %v439_v0  ;;  %v441_v34 = vadd.f32 %v409_v54, %v1552_v1  ;;  %v523_v35 = vadd.f32 1.0, %v1249_v25  ;;  %v347_v38 = vmul.f32 0.044715, %v1577_v33  ;;  %v1581_v39 = vpop.f32.mrb[26].mxu0 }
 0x15d   :  { %1260 = vtanh.f32 %v470_v29  ;;  %v472_v40 = vmul.f32 0.7978846, %v440_v30  ;;  %v525_v42 = vadd.f32 1.0, %v1251_v47  ;;  %v378_v28 = vmul.f32 %v346_v32, %v1572_v23  ;;  %v1584_v43 = vpop.f32.mrb[27].mxu0 }
 0x15e   :  { %1262 = vtanh.f32 %v471_v53  ;;  %v473_v44 = vmul.f32 0.7978846, %v441_v34  ;;  %v555_v46 = vmul.f32 %v523_v35, %v1481_v5  ;;  %v379_v58 = vmul.f32 %v347_v38, %v1577_v33 }
 0x15f   :  { %v1588_v49 = vpop.eup %1252  ;;  %1264 = vtanh.f32 %v472_v40  ;;  %v557_v45 = vmul.f32 %v525_v42, %v1483_v16  ;;  %v410_v59 = vmul.f32 %v378_v28, %v1572_v23  ;;  %v348_v52 = vmul.f32 0.044715, %v1581_v39 }
 0x160   :  { %v1255_v37 = vpop.eup %1254  ;;  %1266 = vtanh.f32 %v473_v44  ;;  %v411_v55 = vmul.f32 %v379_v58, %v1577_v33  ;;  %v349_v56 = vmul.f32 0.044715, %v1584_v43  ;;  %v559_v60 = vmul.f32 %v527_v27, %v303_v19 }
 0x161   :  { %v1595_v61 = vpop.eup %1256  ;;  %v583_v5 = vpack.c.bf16 %v557_v45, %v555_v46  ;;  %v442_v62 = vadd.f32 %v410_v59, %v1572_v23  ;;  %v380_v63 = vmul.f32 %v348_v52, %v1581_v39  ;;  %v561_v2 = vmul.f32 %v529_v36, %v305_v20 }
 0x162   :  { %v1259_v16 = vpop.eup %1258  ;;  %v443_v50 = vadd.f32 %v411_v55, %v1577_v33  ;;  %v381_v3 = vmul.f32 %v349_v56, %v1584_v43  ;;  %v1601_v6 = vpop.f32.mrb[28].mxu0  ;;  %v302_v7 = vmul.f32 0.5, %v1488_v31  ;;  %v304_v8 = vmul.f32 0.5, %v1494_v41 }
 0x163   :  { %838 = vmatprep.mubr.bf16.mxu1 %v583_v5  ;;  %v474_v10 = vmul.f32 0.7978846, %v442_v62  ;;  %v412_v11 = vmul.f32 %v380_v63, %v1581_v39  ;;  %v585_v12 = vpack.c.bf16 %v561_v2, %v559_v60  ;;  %v350_v13 = vmul.f32 0.044715, %v1601_v6  ;;  %v1607_v17 = vpop.f32.mrb[29].mxu0 }
 0x164   :  { %839 = vmatmul.mubr.bf16.vlgmr.msra.gmra.mrb[0].mxu1 %v582_v24  ;;  %v475_v18 = vmul.f32 0.7978846, %v443_v50  ;;  %v413_v19 = vmul.f32 %v381_v3, %v1584_v43  ;;  %v526_v20 = vadd.f32 1.0, %v1556_v4  ;;  %v528_v22 = vadd.f32 1.0, %v1245_v14  ;;  %v1611_v0 = vpop.f32.mrb[30].mxu0 }
 0x165   :  { %1268 = vtanh.f32 %v474_v10  ;;  %v444_v31 = vadd.f32 %v412_v11, %v1581_v39  ;;  %848 = vmatprep.mubr.bf16.mxu1 %v585_v12  ;;  %v382_v41 = vmul.f32 %v350_v13, %v1601_v6  ;;  %v351_v54 = vmul.f32 0.044715, %v1607_v17  ;;  %v1616_v27 = vpop.f32.mrb[31].mxu0 }
 0x166   :  { %1270 = vtanh.f32 %v475_v18  ;;  %v445_v24 = vadd.f32 %v413_v19, %v1584_v43  ;;  %v558_v25 = vmul.f32 %v526_v20, %v302_v7  ;;  %v560_v29 = vmul.f32 %v528_v22, %v304_v8 }
 0x167   :  { %v1261_v30 = vpop.eup %1260  ;;  %v476_v4 = vmul.f32 0.7978846, %v444_v31  ;;  %v414_v14 = vmul.f32 %v382_v41, %v1601_v6  ;;  %v383_v32 = vmul.f32 %v351_v54, %v1607_v17  ;;  %v352_v36 = vmul.f32 0.044715, %v1611_v0 }
 0x168   :  { %v1263_v47 = vpop.eup %1262  ;;  %v477_v53 = vmul.f32 0.7978846, %v445_v24  ;;  %v584_v34 = vpack.c.bf16 %v560_v29, %v558_v25  ;;  %v353_v35 = vmul.f32 0.044715, %v1616_v27  ;;  %v307_v38 = vmul.f32 0.5, %v1517_v15 }
 0x169   :  { %v1265_v40 = vpop.eup %1264  ;;  %1272 = vtanh.f32 %v476_v4  ;;  %v446_v42 = vadd.f32 %v414_v14, %v1601_v6  ;;  %v415_v28 = vmul.f32 %v383_v32, %v1607_v17  ;;  %v384_v44 = vmul.f32 %v352_v36, %v1611_v0 }
 0x16a   :  { %v1267_v46 = vpop.eup %1266  ;;  %1274 = vtanh.f32 %v477_v53  ;;  %v385_v58 = vmul.f32 %v353_v35, %v1616_v27  ;;  %v309_v45 = vmul.f32 0.5, %v1526_v26  ;;  %v531_v59 = vadd.f32 1.0, %v1255_v37 }
 0x16b   :  { %v478_v52 = vmul.f32 0.7978846, %v446_v42  ;;  %v447_v55 = vadd.f32 %v415_v28, %v1607_v17  ;;  %v416_v15 = vmul.f32 %v384_v44, %v1611_v0  ;;  %v533_v56 = vadd.f32 1.0, %v1259_v16 }
 0x16c   :  { %849 = vmatmul.mubr.bf16.gmra.mrb[4].mxu1 %v584_v34  ;;  %v417_v60 = vmul.f32 %v385_v58, %v1616_v27  ;;  %v563_v5 = vmul.f32 %v531_v59, %v307_v38  ;;  %v306_v62 = vmul.f32 0.5, %v1512_v9  ;;  %v308_v37 = vmul.f32 0.5, %v1521_v21 }
 0x16d   :  { %1276 = vtanh.f32 %v478_v52  ;;  %v479_v63 = vmul.f32 0.7978846, %v447_v55  ;;  %v448_v2 = vadd.f32 %v416_v15, %v1611_v0  ;;  %v565_v50 = vmul.f32 %v533_v56, %v309_v45 }
 0x16e   :  { %v449_v26 = vadd.f32 %v417_v60, %v1616_v27  ;;  %v530_v3 = vadd.f32 1.0, %v1588_v49  ;;  %v532_v7 = vadd.f32 1.0, %v1595_v61  ;;  %v535_v18 = vadd.f32 1.0, %v1263_v47 }
 0x16f   :  { %v1269_v16 = vpop.eup %1268  ;;  %1278 = vtanh.f32 %v479_v63  ;;  %v480_v8 = vmul.f32 0.7978846, %v448_v2  ;;  %v587_v10 = vpack.c.bf16 %v565_v50, %v563_v5  ;;  %v311_v19 = vmul.f32 0.5, %v1544_v51 }
 0x170   :  { %v1271_v11 = vpop.eup %1270  ;;  %v481_v12 = vmul.f32 0.7978846, %v449_v26  ;;  %v562_v9 = vmul.f32 %v530_v3, %v306_v62  ;;  %v564_v13 = vmul.f32 %v532_v7, %v308_v37  ;;  %v313_v20 = vmul.f32 0.5, %v1552_v1 }
 0x171   :  { %1280 = vtanh.f32 %v480_v8  ;;  %858 = vmatprep.mubr.bf16.mxu1 %v587_v10  ;;  %v537_v21 = vadd.f32 1.0, %v1267_v46  ;;  %v310_v61 = vmul.f32 0.5, %v1540_v48  ;;  %v534_v22 = vadd.f32 1.0, %v1261_v30 }
 0x172   :  { %1282 = vtanh.f32 %v481_v12  ;;  %v586_v49 = vpack.c.bf16 %v564_v13, %v562_v9  ;;  %v567_v41 = vmul.f32 %v535_v18, %v311_v19  ;;  %v312_v24 = vmul.f32 0.5, %v1548_v57 }
 0x173   :  { %v1273_v31 = vpop.eup %1272  ;;  %v569_v54 = vmul.f32 %v537_v21, %v313_v20  ;;  %v536_v25 = vadd.f32 1.0, %v1265_v40  ;;  %v566_v4 = vmul.f32 %v534_v22, %v310_v61  ;;  %v315_v14 = vmul.f32 0.5, %v1577_v33 }
 0x174   :  { %v1275_v29 = vpop.eup %1274  ;;  %859 = vmatmul.mubr.bf16.gmra.mrb[8].mxu1 %v586_v49  ;;  %v317_v51 = vmul.f32 0.5, %v1584_v43  ;;  %v539_v1 = vadd.f32 1.0, %v1271_v11  ;;  %v538_v53 = vadd.f32 1.0, %v1269_v16  ;;  %v314_v48 = vmul.f32 0.5, %v1572_v23 }
 0x175   :  { %v589_v32 = vpack.c.bf16 %v569_v54, %v567_v41  ;;  %v568_v36 = vmul.f32 %v536_v25, %v312_v24  ;;  %v541_v47 = vadd.f32 1.0, %v1275_v29  ;;  %v316_v30 = vmul.f32 0.5, %v1581_v39 }
 0x176   :  { %v540_v34 = vadd.f32 1.0, %v1273_v31  ;;  %v571_v38 = vmul.f32 %v539_v1, %v315_v14  ;;  %v570_v42 = vmul.f32 %v538_v53, %v314_v48  ;;  %v318_v23 = vmul.f32 0.5, %v1601_v6 }
 0x177   :  { %v1277_v35 = vpop.eup %1276  ;;  %868 = vmatprep.mubr.bf16.mxu1 %v589_v32  ;;  %v588_v57 = vpack.c.bf16 %v568_v36, %v566_v4  ;;  %v573_v40 = vmul.f32 %v541_v47, %v317_v51  ;;  %v320_v39 = vmul.f32 0.5, %v1611_v0  ;;  %v319_v55 = vmul.f32 0.5, %v1607_v17 }
 0x178   :  { %v572_v28 = vmul.f32 %v540_v34, %v316_v30  ;;  %v542_v46 = vadd.f32 1.0, %v1277_v35  ;;  %v321_v15 = vmul.f32 0.5, %v1616_v27 }
 0x179   :  { %v1279_v33 = vpop.eup %1278  ;;  %v591_v44 = vpack.c.bf16 %v573_v40, %v571_v38 }
 0x17a   :  { %v590_v43 = vpack.c.bf16 %v572_v28, %v570_v42  ;;  %v543_v45 = vadd.f32 1.0, %v1279_v33  ;;  %v574_v60 = vmul.f32 %v542_v46, %v318_v23 }
 0x17b   :  { %v1281_v58 = vpop.eup %1280 }
 0x17c   :  { %v1283_v59 = vpop.eup %1282  ;;  %869 = vmatmul.mubr.bf16.gmra.mrb[12].mxu1 %v588_v57  ;;  %v544_v52 = vadd.f32 1.0, %v1281_v58  ;;  %v575_v62 = vmul.f32 %v543_v45, %v319_v55 }
 0x17d   :  { %878 = vmatprep.mubr.bf16.mxu1 %v591_v44  ;;  %v545_v56 = vadd.f32 1.0, %v1283_v59 }
 0x17e   :  { %v576_v5 = vmul.f32 %v544_v52, %v320_v39 }
 0x17f   :  { %v577_v63 = vmul.f32 %v545_v56, %v321_v15 }
 0x180   :  { %v592_v2 = vpack.c.bf16 %v576_v5, %v574_v60 }
 0x181   :  { %v593_v50 = vpack.c.bf16 %v577_v63, %v575_v62 }
 0x184   :  { %879 = vmatmul.mubr.bf16.gmra.mrb[16].mxu1 %v590_v43 }
 0x185   :  { %888 = vmatprep.mubr.bf16.mxu1 %v593_v50 }
 0x18c   :  { %889 = vmatmul.mubr.bf16.gmra.mrb[20].mxu1 %v592_v2 }
 0x21e   :  { %v820_v26 = vpop.f32.mrb[32].mxu0 }
 0x21f   :  { %v822_v6 = vpop.f32.mrb[33].mxu0 }
 0x220   :  { %v1093_v37 = vpack.c.bf16 %v822_v6, %v820_v26  ;;  %v824_v0 = vpop.f32.mrb[34].mxu0 }
 0x221   :  { %v826_v3 = vpop.f32.mrb[35].mxu0 }
 0x222   :  { %995 = vst [vmem:[#allocation8] sm:$0xff] %v1093_v37  ;;  %v1094_v7 = vpack.c.bf16 %v826_v3, %v824_v0 }
 0x224   :  { %996 = vst [vmem:[#allocation8 + $0x8] sm:$0xff] %v1094_v7 }
 0x227   :  { %v830_v17 = vpop.f32.mrb[36].mxu0 }
 0x228   :  { %v832_v27 = vpop.f32.mrb[37].mxu0 }
 0x229   :  { %v1095_v16 = vpack.c.bf16 %v832_v27, %v830_v17  ;;  %v834_v8 = vpop.f32.mrb[38].mxu0 }
 0x22a   :  { %v836_v10 = vpop.f32.mrb[39].mxu0 }
 0x22b   :  { %997 = vst [vmem:[#allocation8 + $0x10] sm:$0xff] %v1095_v16  ;;  %v1096_v11 = vpack.c.bf16 %v836_v10, %v834_v8 }
 0x22d   :  { %998 = vst [vmem:[#allocation8 + $0x18] sm:$0xff] %v1096_v11 }
 0x237   :  { %v840_v12 = vpop.f32.mrb[0].mxu1 }
 0x238   :  { %v842_v9 = vpop.f32.mrb[1].mxu1 }
 0x239   :  { %v1097_v13 = vpack.c.bf16 %v842_v9, %v840_v12  ;;  %v844_v18 = vpop.f32.mrb[2].mxu1 }
 0x23a   :  { %v846_v19 = vpop.f32.mrb[3].mxu1 }
 0x23b   :  { %999 = vst [vmem:[#allocation8 + $0x20] sm:$0xff] %v1097_v13  ;;  %v1098_v20 = vpack.c.bf16 %v846_v19, %v844_v18 }
 0x23d   :  { %1000 = vst [vmem:[#allocation8 + $0x28] sm:$0xff] %v1098_v20 }
 0x23f   :  { %v850_v21 = vpop.f32.mrb[4].mxu1 }
 0x240   :  { %v852_v49 = vpop.f32.mrb[5].mxu1 }
 0x241   :  { %v1099_v61 = vpack.c.bf16 %v852_v49, %v850_v21  ;;  %v854_v22 = vpop.f32.mrb[6].mxu1 }
 0x242   :  { %v856_v31 = vpop.f32.mrb[7].mxu1 }
 0x243   :  { %1001 = vst [vmem:[#allocation8 + $0x30] sm:$0xff] %v1099_v61  ;;  %v1100_v41 = vpack.c.bf16 %v856_v31, %v854_v22 }
 0x245   :  { %1002 = vst [vmem:[#allocation8 + $0x38] sm:$0xff] %v1100_v41 }
 0x247   :  { %v860_v54 = vpop.f32.mrb[8].mxu1 }
 0x248   :  { %v862_v24 = vpop.f32.mrb[9].mxu1 }
 0x249   :  { %v1101_v25 = vpack.c.bf16 %v862_v24, %v860_v54  ;;  %v864_v29 = vpop.f32.mrb[10].mxu1 }
 0x24a   :  { %v866_v4 = vpop.f32.mrb[11].mxu1 }
 0x24b   :  { %1003 = vst [vmem:[#allocation8 + $0x40] sm:$0xff] %v1101_v25  ;;  %v1102_v14 = vpack.c.bf16 %v866_v4, %v864_v29 }
 0x24d   :  { %1004 = vst [vmem:[#allocation8 + $0x48] sm:$0xff] %v1102_v14 }
 0x24f   :  { %v870_v51 = vpop.f32.mrb[12].mxu1 }
 0x250   :  { %v872_v1 = vpop.f32.mrb[13].mxu1 }
 0x251   :  { %v1103_v32 = vpack.c.bf16 %v872_v1, %v870_v51  ;;  %v874_v36 = vpop.f32.mrb[14].mxu1 }
 0x252   :  { %v876_v47 = vpop.f32.mrb[15].mxu1 }
 0x253   :  { %1005 = vst [vmem:[#allocation8 + $0x50] sm:$0xff] %v1103_v32  ;;  %v1104_v53 = vpack.c.bf16 %v876_v47, %v874_v36 }
 0x255   :  { %1006 = vst [vmem:[#allocation8 + $0x58] sm:$0xff] %v1104_v53 }
 0x257   :  { %v880_v48 = vpop.f32.mrb[16].mxu1 }
 0x258   :  { %v882_v30 = vpop.f32.mrb[17].mxu1 }
 0x259   :  { %v1105_v34 = vpack.c.bf16 %v882_v30, %v880_v48  ;;  %v884_v35 = vpop.f32.mrb[18].mxu1 }
 0x25a   :  { %v886_v57 = vpop.f32.mrb[19].mxu1 }
 0x25b   :  { %1007 = vst [vmem:[#allocation8 + $0x60] sm:$0xff] %v1105_v34  ;;  %v1106_v38 = vpack.c.bf16 %v886_v57, %v884_v35 }
 0x25d   :  { %1008 = vst [vmem:[#allocation8 + $0x68] sm:$0xff] %v1106_v38 }
 0x25f   :  { %v890_v40 = vpop.f32.mrb[20].mxu1 }
 0x260   :  { %v892_v42 = vpop.f32.mrb[21].mxu1 }
 0x261   :  { %v1107_v28 = vpack.c.bf16 %v892_v42, %v890_v40  ;;  %v894_v33 = vpop.f32.mrb[22].mxu1 }
 0x262   :  { %v896_v44 = vpop.f32.mrb[23].mxu1 }
 0x263   :  { %1009 = vst [vmem:[#allocation8 + $0x70] sm:$0xff] %v1107_v28  ;;  %v1108_v43 = vpack.c.bf16 %v896_v44, %v894_v33 }
 0x265   :  { %1010 = vst [vmem:[#allocation8 + $0x78] sm:$0xff] %v1108_v43 }
 0x266   :  { %1361 = shalt.err (!%p1358_p0)
}
 0x267   :  { %s1362_s27 = scalar_lea.hbm %s1668_s3, 2048 }
 0x268   :  { %p1363_p1 = scmp.ne.s32.totalorder %s1668_s3, %s1362_s27  ;;  %p1366_p2 = scmp.lt.u32.totalorder %s1362_s27, %s1668_s3 }
 0x26a   :  { %p1368_p3 = pnand %p1366_p2, %p1363_p1 }
 0x26c   :  { %1371 = shalt.err (!%p1368_p3)
}
 0x26d   :  { %1022 = dma.vmem_to_hbm [thread:$0]  %s1017_s21, 2048, %s1668_s3, [#allocation4], %s1380_s24, %s1380_s24, %s1381_s25  }
 0x26e   :  { %1376 = dma.done.wait [#allocation4], 2048  }
 0x26f   :  { %1377 = vsyncadd [#allocation4], 4294965248 }
 0x270   :  { %1026 = vsyncpa [#allocation3], 1 }
 0x271   :  { %1027 = vsyncpa [#allocation6], 1 }
 0x272   :  { %1028 = vsyncpa [#allocation4], 1 }

</bundles_post_ra>
